<compile_context>
chip_gen: v5e
topology: v5e:2x2
jax: 0.10.0
libtpu: 0.0.40
codegen_flags: <defaults>
</compile_context>

<pallas_src>
import functools

import jax
import jax.numpy as jnp
import numpy as np
from jax import lax
from jax.experimental import pallas as pl
from jax.experimental.pallas import tpu as pltpu


# --------------------------------------------------------------------------- #
# Fused single-pass kernel: block = (Bn, C, S)                                 #
# --------------------------------------------------------------------------- #
def _se_fused_kernel(x_ref, w1t_ref, b1_ref, w2_ref, b2_ref, o_ref, *, inv_s):
    x = x_ref[...]                                            # (Bn, C, S), input dtype

    # ---- Squeeze: global average pool (f32 sum * compile-time 1/S). ----------
    pooled = jnp.sum(x.astype(jnp.float32), axis=-1, keepdims=True) * inv_s   # (Bn, C, 1)

    # ---- Excite: the two 1x1x1 convs as VPU broadcast-mult + reduces. --------
    # Layer 1: h1[b, j] = sum_c pooled[b, c] * w1t[c, j] + b1[j]
    h1 = jnp.sum(pooled * w1t_ref[...][None], axis=1, keepdims=True) \
        + b1_ref[...][None]                                   # (Bn, 1, Cr)
    h1 = jnp.maximum(h1, 0.0)                                 # ReLU
    # Layer 2: h2[b, i] = sum_j w2[i, j] * h1[b, j] + b2[i]
    h2 = jnp.sum(w2_ref[...][None] * h1, axis=-1, keepdims=True) \
        + b2_ref[...][None]                                   # (Bn, C, 1)
    gate = jax.nn.sigmoid(h2).astype(x.dtype)                 # (Bn, C, 1)

    # ---- Scale: broadcast channel gate over lanes; single lane-dense store. --
    o_ref[...] = (x * gate).astype(o_ref.dtype)


# --------------------------------------------------------------------------- #
# Split path kernels: pool (tiled reduce) and scale (tiled multiply)           #
# --------------------------------------------------------------------------- #
def _se_pool_kernel(x_ref, sums_ref, *, s_total, ts):
    s_idx = pl.program_id(1)

    @pl.when(s_idx == 0)
    def _():
        sums_ref[...] = jnp.zeros_like(sums_ref)

    x = x_ref[0]                                              # (C, Ts)
    lane = lax.broadcasted_iota(jnp.int32, x.shape, 1)
    valid = (s_idx * ts + lane) < s_total                     # mask the ragged tail
    xf = jnp.where(valid, x.astype(jnp.float32), 0.0)
    sums_ref[...] += jnp.sum(xf, axis=-1, keepdims=True)[None]   # (1, C, 1)


def _se_scale_kernel(gate_ref, x_ref, o_ref):
    # gate block (1, C, 1) broadcasts over the lane-dense (1, C, Ts) x block.
    o_ref[...] = (x_ref[...] * gate_ref[...]).astype(o_ref.dtype)


# --------------------------------------------------------------------------- #
# Wrappers / dispatch                                                          #
# --------------------------------------------------------------------------- #
def _vmem_budget_bytes():
    """Generation-aware VMEM cap (~85% of physical, conservative fallback)."""
    try:
        cap = int(pltpu.get_tpu_info().vmem_capacity_bytes)
    except Exception:
        cap = 64 << 20          # v7x physical VMEM; safe lower bound everywhere
    return max(16 << 20, int(cap * 0.85))


def _se_fused(x_ncs, w1, b1, w2, b2, *, bn, vmem_limit):
    N, C, S = x_ncs.shape
    Cr = w1.shape[0]

    # Lay out weights so the kernel only does broadcast-mult + reduce.
    w1t = w1.T                      # (C, Cr)
    b1_2d = b1.reshape(1, Cr)       # (1, Cr)
    w2_2d = w2.reshape(C, Cr)       # (C, Cr)
    b2_2d = b2.reshape(C, 1)        # (C, 1)

    kernel = functools.partial(_se_fused_kernel, inv_s=1.0 / float(S))

    return pl.pallas_call(
        kernel,
        out_shape=jax.ShapeDtypeStruct((N, C, S), x_ncs.dtype),
        grid_spec=pltpu.PrefetchScalarGridSpec(
            num_scalar_prefetch=0,
            grid=(N // bn,),
            in_specs=[
                pl.BlockSpec((bn, C, S), lambda n: (n, 0, 0)),   # x (packed batches)
                pl.BlockSpec((C, Cr), lambda n: (0, 0)),         # w1^T
                pl.BlockSpec((1, Cr), lambda n: (0, 0)),         # b1
                pl.BlockSpec((C, Cr), lambda n: (0, 0)),         # w2
                pl.BlockSpec((C, 1), lambda n: (0, 0)),          # b2
            ],
            out_specs=pl.BlockSpec((bn, C, S), lambda n: (n, 0, 0)),
        ),
        compiler_params=pltpu.CompilerParams(
            dimension_semantics=("parallel",),
            vmem_limit_bytes=int(vmem_limit),
        ),
    )(x_ncs, w1t, b1_2d, w2_2d, b2_2d)


def _se_split(x_ncs, w1, b1, w2, b2, *, vmem_limit, spatial_tile=None):
    """Two-kernel fallback: tiled pool -> tiny JAX gate MLP -> tiled scale."""
    N, C, S = x_ncs.shape
    itemsize = x_ncs.dtype.itemsize

    if spatial_tile is None:
        def fits(t):
            # in + out tiles double-buffered (x4) + f32 temp for masked cast + margin
            return 4 * C * t * itemsize + C * t * 4 + (2 << 20) <= vmem_limit
        ts = 512
        while ts > 128 and not fits(ts):
            ts //= 2
        while ts * 2 <= 4096 and ts * 2 <= S and fits(ts * 2):
            ts *= 2
    else:
        ts = int(spatial_tile)
    n_tiles = pl.cdiv(S, ts)

    # ---- Pass 1: per-(n, spatial-tile) f32 partial sums into (N, C, 1). ------
    sums = pl.pallas_call(
        functools.partial(_se_pool_kernel, s_total=S, ts=ts),
        out_shape=jax.ShapeDtypeStruct((N, C, 1), jnp.float32),
        grid_spec=pltpu.PrefetchScalarGridSpec(
            num_scalar_prefetch=0,
            grid=(N, n_tiles),
            in_specs=[pl.BlockSpec((1, C, ts), lambda n, s: (n, 0, s))],
            out_specs=pl.BlockSpec((1, C, 1), lambda n, s: (n, 0, 0)),
        ),
        compiler_params=pltpu.CompilerParams(
            dimension_semantics=("parallel", "arbitrary"),
            vmem_limit_bytes=int(vmem_limit),
        ),
    )(x_ncs)

    # ---- Tiny excitation MLP in plain JAX (negligible vs the HBM passes). ----
    pooled = sums[:, :, 0] * (1.0 / float(S))                       # (N, C) f32
    h1 = jnp.maximum(pooled @ w1.astype(jnp.float32).T + b1.astype(jnp.float32), 0.0)
    gate = jax.nn.sigmoid(h1 @ w2.astype(jnp.float32).T + b2.astype(jnp.float32))
    gate = gate.astype(x_ncs.dtype)[:, :, None]                     # (N, C, 1)

    # ---- Pass 2: tiled broadcast-multiply; fully parallel grid (2-TC v7x). ---
    return pl.pallas_call(
        _se_scale_kernel,
        out_shape=jax.ShapeDtypeStruct((N, C, S), x_ncs.dtype),
        grid_spec=pltpu.PrefetchScalarGridSpec(
            num_scalar_prefetch=0,
            grid=(N, n_tiles),
            in_specs=[
                pl.BlockSpec((1, C, 1), lambda n, s: (n, 0, 0)),    # gate
                pl.BlockSpec((1, C, ts), lambda n, s: (n, 0, s)),   # x tile
            ],
            out_specs=pl.BlockSpec((1, C, ts), lambda n, s: (n, 0, s)),
        ),
        compiler_params=pltpu.CompilerParams(
            dimension_semantics=("parallel", "parallel"),
            vmem_limit_bytes=int(vmem_limit),
        ),
    )(gate, x_ncs)


def squeeze_and_excitation(x_ncs, w1, b1, w2, b2):
    """x_ncs: (N, C, S); w1: (Cr, C); b1: (Cr,); w2: (C, Cr); b2: (C,)."""
    N, C, S = x_ncs.shape
    budget = _vmem_budget_bytes()
    itemsize = x_ncs.dtype.itemsize
    per_batch = C * S * itemsize

    def fused_need(bn):
        block = bn * per_batch
        # x + out slabs double-buffered, plus the f32 cast temp for sub-f32 inputs.
        f32_temp = bn * C * S * 4 if x_ncs.dtype != jnp.float32 else 0
        return 4 * block + f32_temp + (2 << 20)

    # Pick batch packing: amortize per-step overhead with big DMAs, but keep
    # >= 2 parallel grid steps when N >= 2 so both v7x TensorCores get work.
    target_block = min(8 << 20, budget // 6)
    candidates = [d for d in range(1, N + 1) if N % d == 0]
    bn = 0
    for d in candidates:
        if d * per_batch > target_block or fused_need(d) > budget:
            continue
        if N >= 2 and N // d < 2:
            continue
        bn = d
    if bn == 0:
        # Fused-first policy (v5e/v6e): take any block that still fits VMEM.
        for d in candidates:
            if fused_need(d) <= budget:
                bn = d
                break

    if bn >= 1:
        return _se_fused(x_ncs, w1, b1, w2, b2, bn=bn, vmem_limit=budget)
    # Per-batch slab too large for VMEM (e.g. big 3D volumes on v7x): split.
    return _se_split(x_ncs, w1, b1, w2, b2, vmem_limit=budget)


def se_forward(x, w1, b1, w2, b2):
    """x: (N, C, H, W, D) — matches the PyTorch module input layout."""
    N, C, H, W, D = x.shape
    x_ncs = x.reshape(N, C, H * W * D)          # no padding: kernel covers true S
    out = squeeze_and_excitation(x_ncs, w1, b1, w2, b2)
    return out.reshape(N, C, H, W, D)


def se_reference(x, w1, b1, w2, b2):
    """Plain-JAX reference of the PyTorch forward, for correctness checking."""
    pooled = jnp.mean(x.astype(jnp.float32), axis=(2, 3, 4))    # (N, C)
    h1 = jnp.maximum(pooled @ w1.T + b1, 0.0)                   # (N, Cr)
    gate = jax.nn.sigmoid(h1 @ w2.T + b2).astype(x.dtype)       # (N, C)
    return x * gate[:, :, None, None, None]


if __name__ == "__main__":
    key = jax.random.PRNGKey(0)
    kx, kw1, kb1, kw2, kb2, kx2 = jax.random.split(key, 6)

    # Case 1: small shape, fused single-pass path (n_channels=16 -> reduced=2).
    N, C, H, W, D = 2, 16, 4, 4, 4
    Cr = C // 8
    x = jax.random.normal(kx, (N, C, H, W, D), dtype=jnp.float32)
    # Conv3d(C, Cr, 1) weight is (Cr, C, 1, 1, 1); kept as the (Cr, C) matrix.
    w1 = jax.random.normal(kw1, (Cr, C), dtype=jnp.float32) * 0.1
    b1 = jax.random.normal(kb1, (Cr,), dtype=jnp.float32) * 0.1
    w2 = jax.random.normal(kw2, (C, Cr), dtype=jnp.float32) * 0.1
    b2 = jax.random.normal(kb2, (C,), dtype=jnp.float32) * 0.1

    out = jax.block_until_ready(se_forward(x, w1, b1, w2, b2))
    ref = jax.block_until_ready(se_reference(x, w1, b1, w2, b2))
    assert out.shape == x.shape
    np.testing.assert_allclose(np.asarray(out), np.asarray(ref),
                               rtol=1e-5, atol=1e-5)

    # Case 2: exercise the pool+scale split fallback (used when the fused slab
    # would not fit VMEM) on a spatial size that is NOT a tile multiple, so the
    # ragged-tail masking and partial output writes are covered.
    H2, W2, D2 = 8, 8, 5                         # S = 320 -> 3 tiles of 128
    x2 = jax.random.normal(kx2, (N, C, H2, W2, D2), dtype=jnp.float32)
    x2_ncs = x2.reshape(N, C, H2 * W2 * D2)
    out2 = _se_split(x2_ncs, w1, b1, w2, b2, vmem_limit=32 << 20, spatial_tile=128)
    out2 = jax.block_until_ready(out2).reshape(x2.shape)
    ref2 = jax.block_until_ready(se_reference(x2, w1, b1, w2, b2))
    np.testing.assert_allclose(np.asarray(out2), np.asarray(ref2),
                               rtol=1e-5, atol=1e-5)

    print("KERNEL_OK")
</pallas_src>

<mosaic_0001>
module attributes {stable_mosaic.version = 11 : i64} {
  func.func @_se_fused_kernel(%arg0: i32, %arg1: memref<1x16x64xf32, #tpu.memory_space<vmem>>, %arg2: memref<16x2xf32, #tpu.memory_space<vmem>>, %arg3: memref<1x2xf32, #tpu.memory_space<vmem>>, %arg4: memref<16x2xf32, #tpu.memory_space<vmem>>, %arg5: memref<16x1xf32, #tpu.memory_space<vmem>>, %arg6: memref<1x16x64xf32, #tpu.memory_space<vmem>>) attributes {dimension_semantics = [#tpu.dimension_semantics<parallel>], iteration_bounds = array<i64: 2>, scalar_prefetch = 0 : i64, scratch_operands = 0 : i64, tpu.core_type = #tpu.core_type<tc>, window_params = [{transform_indices = @transform_0, window_bounds = array<i64: 1, 16, 64>}, {pipeline_mode = #tpu.pipeline_mode<synchronous>, transform_indices = @transform_1, window_bounds = array<i64: 16, 2>}, {pipeline_mode = #tpu.pipeline_mode<synchronous>, transform_indices = @transform_2, window_bounds = array<i64: 1, 2>}, {pipeline_mode = #tpu.pipeline_mode<synchronous>, transform_indices = @transform_3, window_bounds = array<i64: 16, 2>}, {pipeline_mode = #tpu.pipeline_mode<synchronous>, transform_indices = @transform_4, window_bounds = array<i64: 16, 1>}, {transform_indices = @transform_5, window_bounds = array<i64: 1, 16, 64>}]} {
    %c0 = arith.constant 0 : index
    %c0_0 = arith.constant 0 : index
    %c0_1 = arith.constant 0 : index
    %0 = vector.load %arg1[%c0, %c0_0, %c0_1] : memref<1x16x64xf32, #tpu.memory_space<vmem>>, vector<1x16x64xf32>
    %cst = arith.constant dense<0.000000e+00> : vector<1x16xf32>
    %1 = vector.multi_reduction <add>, %0, %cst [2] : vector<1x16x64xf32> to vector<1x16xf32>
    %2 = vector.shape_cast %1 : vector<1x16xf32> to vector<1x16x1xf32>
    %cst_2 = arith.constant 1.562500e-02 : f32
    %3 = vector.broadcast %cst_2 : f32 to vector<1x16x1xf32>
    %4 = arith.mulf %2, %3 : vector<1x16x1xf32>
    %c0_3 = arith.constant 0 : index
    %c0_4 = arith.constant 0 : index
    %5 = vector.load %arg2[%c0_3, %c0_4] : memref<16x2xf32, #tpu.memory_space<vmem>>, vector<16x2xf32>
    %6 = vector.shape_cast %5 : vector<16x2xf32> to vector<1x16x2xf32>
    %7 = vector.broadcast %4 : vector<1x16x1xf32> to vector<1x16x2xf32>
    %8 = arith.mulf %7, %6 : vector<1x16x2xf32>
    %cst_5 = arith.constant dense<0.000000e+00> : vector<1x2xf32>
    %9 = vector.multi_reduction <add>, %8, %cst_5 [1] : vector<1x16x2xf32> to vector<1x2xf32>
    %10 = vector.shape_cast %9 : vector<1x2xf32> to vector<1x1x2xf32>
    %c0_6 = arith.constant 0 : index
    %c0_7 = arith.constant 0 : index
    %11 = vector.load %arg3[%c0_6, %c0_7] : memref<1x2xf32, #tpu.memory_space<vmem>>, vector<1x2xf32>
    %12 = vector.shape_cast %11 : vector<1x2xf32> to vector<1x1x2xf32>
    %13 = arith.addf %10, %12 : vector<1x1x2xf32>
    %cst_8 = arith.constant 0.000000e+00 : f32
    %14 = vector.broadcast %cst_8 : f32 to vector<1x1x2xf32>
    %15 = arith.maximumf %13, %14 : vector<1x1x2xf32>
    %c0_9 = arith.constant 0 : index
    %c0_10 = arith.constant 0 : index
    %16 = vector.load %arg4[%c0_9, %c0_10] : memref<16x2xf32, #tpu.memory_space<vmem>>, vector<16x2xf32>
    %17 = vector.shape_cast %16 : vector<16x2xf32> to vector<1x16x2xf32>
    %18 = vector.broadcast %15 : vector<1x1x2xf32> to vector<1x16x2xf32>
    %19 = arith.mulf %17, %18 : vector<1x16x2xf32>
    %cst_11 = arith.constant dense<0.000000e+00> : vector<1x16xf32>
    %20 = vector.multi_reduction <add>, %19, %cst_11 [2] : vector<1x16x2xf32> to vector<1x16xf32>
    %21 = vector.shape_cast %20 : vector<1x16xf32> to vector<1x16x1xf32>
    %c0_12 = arith.constant 0 : index
    %c0_13 = arith.constant 0 : index
    %22 = vector.load %arg5[%c0_12, %c0_13] : memref<16x1xf32, #tpu.memory_space<vmem>>, vector<16x1xf32>
    %23 = vector.shape_cast %22 : vector<16x1xf32> to vector<1x16x1xf32>
    %24 = arith.addf %21, %23 : vector<1x16x1xf32>
    %25 = arith.negf %24 : vector<1x16x1xf32>
    %26 = math.exp %25 : vector<1x16x1xf32>
    %cst_14 = arith.constant 1.000000e+00 : f32
    %27 = vector.broadcast %cst_14 : f32 to vector<1x16x1xf32>
    %28 = arith.addf %27, %26 : vector<1x16x1xf32>
    %29 = arith.divf %27, %28 : vector<1x16x1xf32>
    %30 = vector.broadcast %29 : vector<1x16x1xf32> to vector<1x16x64xf32>
    %31 = arith.mulf %0, %30 : vector<1x16x64xf32>
    %c0_15 = arith.constant 0 : index
    %c0_16 = arith.constant 0 : index
    %c0_17 = arith.constant 0 : index
    %32 = vector.load %arg6[%c0_15, %c0_16, %c0_17] : memref<1x16x64xf32, #tpu.memory_space<vmem>>, vector<1x16x64xf32>
    tpu.vector_store %arg6[%c0_15, %c0_16, %c0_17], %31 {strides = array<i32>} : memref<1x16x64xf32, #tpu.memory_space<vmem>>, vector<1x16x64xf32>,
    return
  }
  func.func @transform_0(%arg0: i32) -> (i32, i32, i32) {
    %c0_i32 = arith.constant 0 : i32
    %c0_i32_0 = arith.constant 0 : i32
    %c0_i32_1 = arith.constant 0 : i32
    return %arg0, %c0_i32, %c0_i32_0 : i32, i32, i32
  }
  func.func @transform_1(%arg0: i32) -> (i32, i32) {
    %c0_i32 = arith.constant 0 : i32
    %c0_i32_0 = arith.constant 0 : i32
    %c0_i32_1 = arith.constant 0 : i32
    return %c0_i32, %c0_i32_0 : i32, i32
  }
  func.func @transform_2(%arg0: i32) -> (i32, i32) {
    %c0_i32 = arith.constant 0 : i32
    %c0_i32_0 = arith.constant 0 : i32
    %c0_i32_1 = arith.constant 0 : i32
    return %c0_i32, %c0_i32_0 : i32, i32
  }
  func.func @transform_3(%arg0: i32) -> (i32, i32) {
    %c0_i32 = arith.constant 0 : i32
    %c0_i32_0 = arith.constant 0 : i32
    %c0_i32_1 = arith.constant 0 : i32
    return %c0_i32, %c0_i32_0 : i32, i32
  }
  func.func @transform_4(%arg0: i32) -> (i32, i32) {
    %c0_i32 = arith.constant 0 : i32
    %c0_i32_0 = arith.constant 0 : i32
    %c0_i32_1 = arith.constant 0 : i32
    return %c0_i32, %c0_i32_0 : i32, i32
  }
  func.func @transform_5(%arg0: i32) -> (i32, i32, i32) {
    %c0_i32 = arith.constant 0 : i32
    %c0_i32_0 = arith.constant 0 : i32
    %c0_i32_1 = arith.constant 0 : i32
    return %arg0, %c0_i32, %c0_i32_0 : i32, i32, i32
  }
}

</mosaic_0001>

<bundles_post_ra>
// kernel: tpu_custom_call.1
= control target key start
LH: loop header
LB: loop body
LE: loop exit
PB: predicated region body
PF: predicated region fallthrough
CT: control target
= control target key end

     0   :  { %10 = vsyncpa [#allocation3], 0  ;;  %s683_s0 = inlined_call_operand.vmem [shape: f32[2,16,64], index: 0, kind: input, shape index: {}]   ;;  %s684_s1 = inlined_call_operand.vmem [shape: f32[16,2], index: 1, kind: input, shape index: {}]   ;;  %s685_s2 = inlined_call_operand.vmem [shape: f32[1,2], index: 2, kind: input, shape index: {}]   ;;  %s686_s3 = inlined_call_operand.vmem [shape: f32[16,2], index: 3, kind: input, shape index: {}]   ;;  %s687_s4 = inlined_call_operand.vmem [shape: f32[16,1], index: 4, kind: input, shape index: {}]   ;;  %s688_s5 = inlined_call_operand.hbm [shape: f32[2,16,64], index: 5, kind: output, shape index: {}]  }
   0x1   :  { %12 = vsyncpa [#allocation3 + $0x1], 0  ;;  %s561_s18 = smov 0   ;;  %s563_s19 = smov 0  }
   0x2   :  { %s565_s20 = smov 0   ;;  %s567_s21 = smov 0  }
   0x3 LB: > { %s582_s22 = sadd.s32 4294967295, %s526_s21   ;;  %s396_s23 = sadd.s32 4294967294, %s526_s21   ;;  %s526_s21 = sphi %s567_s21, %s694_s21   ;;  %s522_s20 = sphi %s565_s20, %s693_s20   ;;  %s518_s19 = sphi %s563_s19, %s692_s19   ;;  %s514_s18 = sphi %s561_s18, %s691_s18  }
   0x4   : > { %s586_s24 = sadd.s32 1, %s526_s21   ;;  %s135_s25 = sadd.s32 1, %s522_s20 }
   0x5   : > { %s132_s26 = ssub.s32 %s526_s21, %s586_s24  ;;  %p145_p0 = scmp.ne.s32.totalorder %s522_s20, %s518_s19 }
   0x6   : > { %p133_p1 = scmp.eq.s32.totalorder %s132_s26, 0  ;;  %p146_p2 = scmp.eq.s32.totalorder %s582_s22, 1 }
   0x7   : > { %p151_p3 = scmp.ne.s32.totalorder %s518_s19, %s514_s18  ;;  %p152_p4 = scmp.eq.s32.totalorder %s396_s23, 1 }
   0x8   : > { %s597_s27 = scalar_select %p133_p1, %s522_s20, %s135_s25  }
   0x9   : > { %p599_p5 = por %p146_p2, %p145_p0  ;;  %p603_p6 = por %p152_p4, %p151_p3 }
   0xa   : > { %p399_p7 = scmp.ge.s32.totalorder %s526_s21, 1  ;;  %p190_p8 = scmp.lt.s32.totalorder %s526_s21, 3 }
   0xc   : > { %p191_p9 = pnand %p399_p7, %p190_p8 }
   0xd   : > { %p218_p10 = scmp.lt.s32.totalorder (!%p191_p9), %s582_s22, 1  ;;  %s215_s8 = sand.u32 (!%p191_p9), 1, %s518_s19  }
   0xe   : > { %194 = sbr.rel (%p191_p9) target bundleno = 428 (0x1ac), region = 40  ;;  %s411_s10 = sshll.u32 (!%p191_p9), %s582_s22, 4 }
   0xf   : > { %s330_s13 = scalar_lea.hbm (!%p191_p9), %s688_s5, %s411_s10 }
  0x10   : > { %s333_s16 = sshll.u32 (!%p191_p9), %s330_s13, 4  ;;  %s334_s16 = int_to_ptr.hbm [resolvable:$true] %s333_s16 }
  0x11   : > { %s478_s17 = sshra.s32 (!%p191_p9), %s334_s16, 4  ;;  %s479_s17 = int_to_ptr.hbm [resolvable:$true] %s478_s17 }
  0x12   : > { %s480_s23 = scalar_lea.hbm (!%p191_p9), %s479_s17, 16  ;;  %p485_p0 = scmp.lt.s32.totalorder (!%p191_p9), %s479_s17, %s688_s5 }
  0x13   : > { %s219_s30 = scalar_select %p218_p10, %s582_s22, 1  ;;  %vm225_vm0 = vcmask 523264   ;;  %v234_v6 = vld [vmem:[%s684_s1] sm:$0xff]  ;;  %v235_v7 = vld [vmem:[%s684_s1 + $0x8] sm:$0xff]  ;;  %vm238_vm1 = vcmask 15360   ;;  %v528_v31 = vmov 0  }
  0x14   : > { %v248_v20 = vld [vmem:[%s685_s2] sm:$0x1]  ;;  %v252_v28 = vld [vmem:[%s686_s3 + $0x8] sm:$0xff]  ;;  %454 = vset.pattern.permute.xlu2 %v528_v31  ;;  %455 = vset.pattern.permute.xlu0 %v528_v31  ;;  %s319_s22 = scalar_lea.sflag [#allocation3], %s215_s8  ;;  %p481_p11 = scmp.ne.s32.totalorder %s479_s17, %s480_s23 }
  0x15   : > { %s410_s6 = sshll.u32 %s219_s30, 4  ;;  %v251_v24 = vld [vmem:[%s686_s3] sm:$0xff]  ;;  %v263_v36 = vld [vmem:[%s687_s4 + $0x8] sm:$0xff]  ;;  %s484_s30 = scalar_lea.hbm %s688_s5, 32 }
  0x16   : > { %s222_s9 = scalar_lea.vmem %s683_s0, %s410_s6  ;;  %v262_v32 = vld [vmem:[%s687_s4] sm:$0xff]  ;;  %p482_p12 = pnand %p481_p11, %p599_p5 }
  0x17   : > { %v614_v0 = vld [vmem:[%s222_s9] sm:$0xff]  ;;  %v618_v2 = vld [vmem:[%s222_s9 + $0x8] sm:$0xff]  ;;  %s400_s9 = sshll.u32 %s215_s8, 4  ;;  %p486_p1 = scmp.lt.s32.totalorder %s484_s30, %s480_s23 }
  0x18   : > { %v226_v1 = vsel %vm225_vm0, %v614_v0, 0.0  ;;  %v229_v3 = vsel %vm225_vm0, %v618_v2, 0.0  ;;  %s217_s14 = scalar_lea.vmem [#allocation2], %s400_s9  ;;  %p483_p13 = pneg %p482_p12 }
  0x19   : > { %227 = vadd.xlane.f32.xlu0 %v226_v1  ;;  %s331_s15 = sshll.u32 %s217_s14, 4  ;;  %p487_p2 = por %p486_p1, %p485_p0  ;;  %s332_s15 = int_to_ptr.vmem [resolvable:$true] %s331_s15 }
  0x1b   : > { %p488_p3 = pnand %p487_p2, %p483_p13 }
  0x21   : > { %230 = vadd.xlane.f32.xlu0 %v229_v3 }
  0x8c   : > { %v228_v4 = vpop.xlane.xlu0 %227 }
  0x8d   : > { %v232_v5 = vmul.f32 0.015625, %v228_v4 }
  0x8f   : > { %v236_v9 = vmul.f32 %v234_v6, %v232_v5 }
  0x91   : > { %v239_v12 = vsel %vm238_vm1, %v236_v9, 0.0 }
  0x94   : > { %v231_v8 = vpop.xlane.xlu0 %230 }
  0x95   : > { %v233_v10 = vmul.f32 0.015625, %v231_v8 }
  0x97   : > { %v237_v11 = vmul.f32 %v235_v7, %v233_v10 }
  0x99   : > { %v240_v13 = vsel %vm238_vm1, %v237_v11, 0.0 }
  0x9a   : > { %v241_v14 = vadd.f32 %v240_v13, %v239_v12 }
  0x9c   : > { %v242_v15 = vrot.slane %v241_v14, 4 }
  0x9e   : > { %v243_v16 = vadd.f32 %v242_v15, %v241_v14 }
  0xa0   : > { %v244_v17 = vrot.slane %v243_v16, 2 }
  0xa2   : > { %v245_v18 = vadd.f32 %v244_v17, %v243_v16 }
  0xa4   : > { %v246_v19 = vrot.slane %v245_v18, 1 }
  0xa6   : > { %v247_v21 = vadd.f32 %v246_v19, %v245_v18 }
  0xa8   : > { %v249_v22 = vadd.f32 %v248_v20, %v247_v21 }
  0xaa   : > { %v250_v23 = vmax.f32 %v249_v22, 0.0 }
  0xac   : > { %v253_v25 = vperm.slane %v250_v23, 0 }
  0xae   : > { %v254_v26 = vmul.f32 %v253_v25, %v251_v24  ;;  %v255_v29 = vmul.f32 %v253_v25, %v252_v28 }
  0xb0   : > { %v256_v27 = vsel %vm238_vm1, %v254_v26, 0.0  ;;  %v259_v30 = vsel %vm238_vm1, %v255_v29, 0.0 }
  0xb1   : > { %257 = vadd.xlane.f32.xlu1 %v256_v27 }
  0xb9   : > { %260 = vadd.xlane.f32.xlu1 %v259_v30 }
 0x124   : > { %v258_v33 = vpop.xlane.xlu1 %257 }
 0x125   : > { %v264_v34 = vadd.f32 %v262_v32, %v258_v33 }
 0x127   : > { %v403_v35 = vmul.f32 -1.442695, %v264_v34 }
 0x129   : > { %456 = vpow2.f32 %v403_v35 }
 0x12c   : > { %v261_v37 = vpop.xlane.xlu1 %260 }
 0x12d   : > { %v265_v38 = vadd.f32 %v263_v36, %v261_v37 }
 0x12f   : > { %v457_v39 = vpop.eup %456  ;;  %v404_v40 = vmul.f32 -1.442695, %v265_v38 }
 0x130   : > { %v272_v41 = vadd.f32 1.0, %v457_v39 }
 0x131   : > { %458 = vpow2.f32 %v404_v40 }
 0x132   : > { %460 = vrcp.f32 %v272_v41  ;;  %v285_v47 = vand.u32 2147483648, %v272_v41  ;;  %v283_v49 = vand.u32 2147483647, %v272_v41  ;;  %vm279_vm3 = vweird.f32 %v272_v41 }
 0x134   : > { %v286_v52 = vor.u32 1.1754944e-38, %v285_v47  ;;  %vm284_vm5 = vcmp.eq.f32.partialorder %v283_v49, 8.507059e+37 }
 0x137   : > { %v459_v42 = vpop.eup %458 }
 0x138   : > { %v461_v43 = vpop.eup %460  ;;  %v273_v44 = vadd.f32 1.0, %v459_v42 }
 0x139   : > { %v275_v45 = vmul.f32 %v461_v43, %v272_v41  ;;  %vm280_vm2 = vweird.f32 %v461_v43 }
 0x13a   : > { %462 = vrcp.f32 %v273_v44  ;;  %vm281_vm4 = vmor %vm279_vm3, %vm280_vm2  ;;  %v300_v57 = vand.u32 2147483648, %v273_v44  ;;  %v298_v59 = vand.u32 2147483647, %v273_v44  ;;  %vm294_vm7 = vweird.f32 %v273_v44 }
 0x13b   : > { %v276_v46 = vsub.f32 1.0, %v275_v45 }
 0x13c   : > { %v301_v61 = vor.u32 1.1754944e-38, %v300_v57  ;;  %vm299_vm9 = vcmp.eq.f32.partialorder %v298_v59, 8.507059e+37 }
 0x13d   : > { %v277_v48 = vmul.f32 %v461_v43, %v276_v46 }
 0x13f   : > { %v278_v50 = vadd.f32 %v461_v43, %v277_v48 }
 0x140   : > { %v463_v51 = vpop.eup %462 }
 0x141   : > { %v282_v53 = vsel %vm281_vm4, %v461_v43, %v278_v50  ;;  %v290_v54 = vmul.f32 %v463_v51, %v273_v44  ;;  %vm295_vm6 = vweird.f32 %v463_v51 }
 0x142   : > { %v287_v55 = vsel %vm284_vm5, %v286_v52, %v282_v53  ;;  %vm296_vm8 = vmor %vm294_vm7, %vm295_vm6 }
 0x143   : > { %306 = vperm.xlu2 %454, %v287_v55   ;;  %v291_v56 = vsub.f32 1.0, %v290_v54 }
 0x145   : > { %v292_v58 = vmul.f32 %v463_v51, %v291_v56 }
 0x147   : > { %v293_v60 = vadd.f32 %v463_v51, %v292_v58 }
 0x149   : > { %v297_v62 = vsel %vm296_vm8, %v463_v51, %v293_v60 }
 0x14a   : > { %v302_v63 = vsel %vm299_vm9, %v301_v61, %v297_v62 }
 0x14b   : > { %311 = vperm.xlu2 %454, %v302_v63  }
 0x19d   : > { %v307_v1 = vpop.permute.xlu2 %306 }
 0x19e   : > { %v314_v3 = vmul.f32 %v307_v1, %v614_v0 }
 0x1a0   : > { %316 = vst.msk [vmem:[%s217_s14] sm:$0xff] %vm225_vm0, %v314_v3 }
 0x1a5   : > { %v312_v4 = vpop.permute.xlu2 %311 }
 0x1a6   : > { %v315_v5 = vmul.f32 %v312_v4, %v618_v2 }
 0x1a8   : > { %317 = vst.msk [vmem:[%s217_s14 + $0x8] sm:$0xff] %vm225_vm0, %v315_v5 }
 0x1a9   : > { %491 = shalt.err (!%p488_p3)
}
 0x1aa   : > { %s529_s8 = smov 128   ;;  %s530_s9 = smov 8  }
 0x1ab   : > { %412 = dma.vmem_to_hbm [thread:$0]  (%p599_p5), %s332_s15, 256, %s334_s16, %s319_s22, %s529_s8, %s529_s8, %s530_s9  }
 0x1ac PF: > { %p418_p4 = scmp.ge.s32.totalorder %s526_s21, 2  ;;  %s348_s10 = sand.u32 1, %s514_s18  }
 0x1ad   : > { %s349_s11 = scalar_lea.sflag [#allocation3], %s348_s10 }
 0x1ae   : > { %p415_p7 = pnand %p418_p4, %p603_p6 }
 0x1b0   : > { %p416_p8 = pneg %p415_p7 }
 0x1b2   : > { %509 = dma.done.wait (%p416_p8), %s349_s11, 256  }
 0x1b3   : > { %511 = vsyncadd (%p416_p8), %s349_s11, 4294967040  ;;  %p15_p9 = scmp.ge.s32.totalorder %s586_s24, 4   ;;  %s691_s18 = smov %s518_s19 }
 0x1b4   : > { %s692_s19 = smov %s522_s20  ;;  %s693_s20 = smov %s597_s27 }
 0x1b5   : > { %s694_s21 = smov %s586_s24  ;;  %17 = sbr.rel (!%p15_p9) target bundleno = 3 (0x3), region = 75 }
 0x1ba   :  { %355 = vsyncpa [#allocation3], 1 }
 0x1bb   :  { %357 = vsyncpa [#allocation3 + $0x1], 1 }

</bundles_post_ra>
